<compile_context>
chip_gen: v7x
topology: tpu7x:2x2x1
jax: 0.10.0
libtpu: 0.0.40
codegen_flags: <defaults>
</compile_context>

<pallas_src>
import math
import functools

import jax
import jax.numpy as jnp
from jax import lax
from jax.experimental import pallas as pl
from jax.experimental.pallas import tpu as pltpu

TEMPERATURE = 0.5


def _dcl_kernel(ci_ref, cj_ref, out_ref,
                gii_ref, gij_ref, gjj_ref, sum_i_ref, sum_j_ref,
                *, class_num, temperature):
    K = class_num
    N = 2 * K
    b = pl.program_id(0)

    # ---------------- init accumulators ----------------
    @pl.when(b == 0)
    def _init():
        gii_ref[...] = jnp.zeros_like(gii_ref)
        gij_ref[...] = jnp.zeros_like(gij_ref)
        gjj_ref[...] = jnp.zeros_like(gjj_ref)
        sum_i_ref[...] = jnp.zeros_like(sum_i_ref)
        sum_j_ref[...] = jnp.zeros_like(sum_j_ref)

    # ---------------- per-tile accumulation (MXU only) ----------------
    ci = ci_ref[...]                       # (TB, K), native dtype
    cj = cj_ref[...]                       # (TB, K), native dtype
    dn = (((0,), (0,)), ((), ()))          # contract over the batch tile

    gii_ref[...] += lax.dot_general(ci, ci, dn, preferred_element_type=jnp.float32)
    gij_ref[...] += lax.dot_general(ci, cj, dn, preferred_element_type=jnp.float32)
    gjj_ref[...] += lax.dot_general(cj, cj, dn, preferred_element_type=jnp.float32)

    sum_i_ref[...] += jnp.sum(ci, axis=0, keepdims=True, dtype=jnp.float32)
    sum_j_ref[...] += jnp.sum(cj, axis=0, keepdims=True, dtype=jnp.float32)

    # ---------------- epilogue (last tile only) ----------------
    @pl.when(b == pl.num_programs(0) - 1)
    def _finalize():
        inv_temp = jnp.float32(1.0 / temperature)

        # --- entropy regularizer (ne_loss) ---
        s_i = sum_i_ref[...]                  # (1, K)
        s_j = sum_j_ref[...]                  # (1, K)
        p_i = s_i / jnp.sum(s_i, axis=1, keepdims=True)
        p_j = s_j / jnp.sum(s_j, axis=1, keepdims=True)
        ne_i = math.log(K) + jnp.sum(p_i * jnp.log(p_i + 1e-8), axis=1,
                                     keepdims=True)
        ne_j = math.log(K) + jnp.sum(p_j * jnp.log(p_j + 1e-8), axis=1,
                                     keepdims=True)
        ne_loss = ne_i + ne_j                 # (1, 1)

        # --- assemble the (N, N) gram once from its symmetric blocks ---
        gii = gii_ref[...]
        gij = gij_ref[...]
        gjj = gjj_ref[...]
        top = jnp.concatenate([gii, gij], axis=1)        # (K, N)
        bot = jnp.concatenate([gij.T, gjj], axis=1)      # (K, N)
        gram = jnp.concatenate([top, bot], axis=0)       # (N, N) f32

        row = lax.broadcasted_iota(jnp.int32, (N, N), 0)
        col = lax.broadcasted_iota(jnp.int32, (N, N), 1)
        eye = row == col

        # row/column norms both come from the gram diagonal (symmetric).
        diag_masked = jnp.where(eye, gram, 0.0)
        diag_row = jnp.sum(diag_masked, axis=1, keepdims=True)   # (N, 1)
        diag_col = jnp.sum(diag_masked, axis=0, keepdims=True)   # (1, N)
        inv_row = lax.rsqrt(jnp.maximum(diag_row, 1e-16)) * inv_temp
        inv_col = lax.rsqrt(jnp.maximum(diag_col, 1e-16))
        sim = gram * inv_col * inv_row                           # (N, N)

        # positives: sim[r, r+K] for r < K, sim[r, r-K] otherwise (no modulo)
        pos_mask = col == jnp.where(row < K, row + K, row - K)
        pos = jnp.sum(jnp.where(pos_mask, sim, 0.0), axis=1, keepdims=True)

        # logits row r = [pos[r], {sim[r, c] : c != r}]; labels are all 0.
        # log_softmax is idempotent, so per-row loss = logsumexp - pos.
        neg_inf = jnp.float32(-jnp.inf)
        sim_off = jnp.where(eye, neg_inf, sim)
        m = jnp.max(sim_off, axis=1, keepdims=True)   # >= pos (pos is off-diag)
        sumexp = jnp.exp(pos - m) + jnp.sum(
            jnp.where(eye, 0.0, jnp.exp(sim - m)), axis=1, keepdims=True)
        lse = m + jnp.log(sumexp)                                  # (N, 1)
        ce = jnp.sum(lse - pos, axis=0, keepdims=True) / N         # (1, 1)

        out_ref[...] = ce + ne_loss


def dynamic_cluster_loss(c_i, c_j, temperature=TEMPERATURE, max_batch_tile=None):
    """Pallas implementation of DynamicClusterLoss.forward(c_i, c_j)."""
    assert c_i.shape == c_j.shape and c_i.ndim == 2
    assert c_i.dtype == c_j.dtype
    batch, K = c_i.shape
    N = 2 * K
    itemsize = jnp.dtype(c_i.dtype).itemsize

    # ---- lane/sublane padded sizes (what VMEM actually costs) ----
    k_lanes = ((K + 127) // 128) * 128
    n_lanes = ((N + 127) // 128) * 128
    k_sub = ((K + 7) // 8) * 8
    n_sub = ((N + 7) // 8) * 8

    # ---- per-generation scoped-VMEM budget ----
    vmem_cap = 0
    try:
        vmem_cap = int(getattr(pltpu.get_tpu_info(), "vmem_capacity_bytes", 0))
    except Exception:
        vmem_cap = 0
    if vmem_cap <= 0:
        vmem_cap = 64 << 20                       # conservative (v7x-sized) fallback
    vmem_budget = min((vmem_cap * 3) // 4, 100 << 20)

    # fixed VMEM: gram blocks + sums + epilogue (N,N) temporaries + slack
    fixed = (3 * k_sub * k_lanes * 4            # G_ii, G_ij, G_jj accumulators
             + 2 * 8 * k_lanes * 4              # sum_i, sum_j
             + 12 * n_sub * n_lanes * 4         # epilogue temporaries (sim/masks/exp)
             + (2 << 20))                       # Mosaic internal scratch headroom

    # ---- choose the batch tile ----
    # bandwidth target: >= ~2 MiB of HBM traffic per input per grid step,
    # capped by the double-buffered, lane-padded VMEM cost of the input tiles.
    tb_bw = max(512, (2 << 20) // max(K * itemsize, 1))
    per_row = 2 * 2 * k_lanes * itemsize         # 2 inputs x 2 pipeline buffers
    tb_cap = max(8, (vmem_budget - fixed) // per_row)
    if max_batch_tile is not None:
        tb_cap = min(tb_cap, int(max_batch_tile))
    tb = min(tb_bw, tb_cap)

    if tb >= batch:
        tb = batch                               # single full block (no 8-div needed)
    else:
        steps = -(-batch // tb)                  # balance rows across grid steps
        tb = -(-batch // steps)
        tb = ((tb + 7) // 8) * 8                 # sublane-align the tile

    pad = (-batch) % tb
    if pad:
        # zero rows are exactly neutral for every accumulated quantity
        c_i = jnp.pad(c_i, ((0, pad), (0, 0)))
        c_j = jnp.pad(c_j, ((0, pad), (0, 0)))
    grid_b = (batch + pad) // tb

    need = fixed + 4 * tb * k_lanes * itemsize
    vmem_limit = int(min(vmem_budget, max(need + (4 << 20), 32 << 20)))

    kernel = functools.partial(_dcl_kernel, class_num=K,
                               temperature=float(temperature))

    out = pl.pallas_call(
        kernel,
        out_shape=jax.ShapeDtypeStruct((1, 1), jnp.float32),
        grid_spec=pltpu.PrefetchScalarGridSpec(
            num_scalar_prefetch=0,
            grid=(grid_b,),
            in_specs=[pl.BlockSpec((tb, K), lambda b: (b, 0)),
                      pl.BlockSpec((tb, K), lambda b: (b, 0))],
            out_specs=pl.BlockSpec((1, 1), lambda b: (0, 0)),
            scratch_shapes=[pltpu.VMEM((K, K), jnp.float32),
                            pltpu.VMEM((K, K), jnp.float32),
                            pltpu.VMEM((K, K), jnp.float32),
                            pltpu.VMEM((1, K), jnp.float32),
                            pltpu.VMEM((1, K), jnp.float32)]),
        compiler_params=pltpu.CompilerParams(
            dimension_semantics=("arbitrary",),
            vmem_limit_bytes=vmem_limit),
    )(c_i, c_j)
    return out[0, 0]


def reference_loss(c_i, c_j, temperature=TEMPERATURE):
    """Pure-JAX transcription of the PyTorch forward, for verification."""
    c_i = c_i.astype(jnp.float32)
    c_j = c_j.astype(jnp.float32)
    K = c_i.shape[1]
    N = 2 * K

    p_i = c_i.sum(0)
    p_i = p_i / p_i.sum()
    ne_i = math.log(K) + (p_i * jnp.log(p_i + 1e-8)).sum()
    p_j = c_j.sum(0)
    p_j = p_j / p_j.sum()
    ne_j = math.log(K) + (p_j * jnp.log(p_j + 1e-8)).sum()

    c = jnp.concatenate([c_i.T, c_j.T], axis=0)              # (N, B)
    norm = jnp.linalg.norm(c, axis=1)
    sim = (c @ c.T) / jnp.maximum(norm[:, None] * norm[None, :], 1e-8) / temperature
    sim_i_j = jnp.diagonal(sim, K)
    sim_j_i = jnp.diagonal(sim, -K)
    pos = jnp.concatenate([sim_i_j, sim_j_i]).reshape(N, 1)
    mask = ~jnp.eye(N, dtype=bool)
    neg = sim[mask].reshape(N, N - 1)
    logits = jnp.concatenate([pos, neg], axis=1)
    logp = jax.nn.log_softmax(jax.nn.log_softmax(logits, axis=1), axis=1)
    loss = -logp[:, 0].sum() / N
    return loss + ne_i + ne_j


if __name__ == "__main__":
    key = jax.random.PRNGKey(0)
    k1, k2 = jax.random.split(key)

    # Case 1: small inputs, single full-batch block.
    batch, class_num = 256, 16
    c_i = jax.nn.softmax(jax.random.normal(k1, (batch, class_num), jnp.float32), axis=1)
    c_j = jax.nn.softmax(jax.random.normal(k2, (batch, class_num), jnp.float32), axis=1)

    out = jax.block_until_ready(dynamic_cluster_loss(c_i, c_j))
    ref = jax.block_until_ready(reference_loss(c_i, c_j))
    assert jnp.isfinite(out), "kernel produced non-finite loss"
    assert abs(float(out) - float(ref)) < 1e-3, (float(out), float(ref))

    # Case 2: force the multi-step grid with zero-row padding (batch not a
    # multiple of the tile) to exercise the streaming-accumulation path.
    batch2 = 200
    c_i2 = jax.nn.softmax(jax.random.normal(k1, (batch2, class_num), jnp.float32), axis=1)
    c_j2 = jax.nn.softmax(jax.random.normal(k2, (batch2, class_num), jnp.float32), axis=1)
    out2 = jax.block_until_ready(dynamic_cluster_loss(c_i2, c_j2, max_batch_tile=64))
    ref2 = jax.block_until_ready(reference_loss(c_i2, c_j2))
    assert abs(float(out2) - float(ref2)) < 1e-3, (float(out2), float(ref2))

    print("KERNEL_OK")
</pallas_src>

<mosaic_0001>
module attributes {stable_mosaic.version = 11 : i64} {
  func.func @_dcl_kernel(%arg0: i32, %arg1: memref<256x16xf32, #tpu.memory_space<vmem>>, %arg2: memref<256x16xf32, #tpu.memory_space<vmem>>, %arg3: memref<1x1xf32, #tpu.memory_space<vmem>>, %arg4: memref<16x16xf32, #tpu.memory_space<vmem>>, %arg5: memref<16x16xf32, #tpu.memory_space<vmem>>, %arg6: memref<16x16xf32, #tpu.memory_space<vmem>>, %arg7: memref<1x16xf32, #tpu.memory_space<vmem>>, %arg8: memref<1x16xf32, #tpu.memory_space<vmem>>) attributes {dimension_semantics = [#tpu.dimension_semantics<arbitrary>], iteration_bounds = array<i64: 1>, scalar_prefetch = 0 : i64, scratch_operands = 5 : i64, tpu.core_type = #tpu.core_type<tc>, window_params = [{transform_indices = @transform_0, window_bounds = array<i64: 256, 16>}, {transform_indices = @transform_1, window_bounds = array<i64: 256, 16>}, {pipeline_mode = #tpu.pipeline_mode<synchronous>, transform_indices = @transform_2, window_bounds = array<i64: 1, 1>}]} {
    %c0_i32 = arith.constant 0 : i32
    %0 = arith.cmpi eq, %arg0, %c0_i32 : i32
    %1 = arith.extui %0 : i1 to i32
    %c0_i32_0 = arith.constant 0 : i32
    %2 = arith.cmpi ne, %1, %c0_i32_0 : i32
    scf.if %2 {
      %cst_30 = arith.constant 0.000000e+00 : f32
      %30 = vector.broadcast %cst_30 : f32 to vector<16x16xf32>
      %c0_31 = arith.constant 0 : index
      %c0_32 = arith.constant 0 : index
      %31 = vector.load %arg4[%c0_31, %c0_32] : memref<16x16xf32, #tpu.memory_space<vmem>>, vector<16x16xf32>
      tpu.vector_store %arg4[%c0_31, %c0_32], %30 {strides = array<i32>} : memref<16x16xf32, #tpu.memory_space<vmem>>, vector<16x16xf32>,
      %cst_33 = arith.constant 0.000000e+00 : f32
      %32 = vector.broadcast %cst_33 : f32 to vector<16x16xf32>
      %c0_34 = arith.constant 0 : index
      %c0_35 = arith.constant 0 : index
      %33 = vector.load %arg5[%c0_34, %c0_35] : memref<16x16xf32, #tpu.memory_space<vmem>>, vector<16x16xf32>
      tpu.vector_store %arg5[%c0_34, %c0_35], %32 {strides = array<i32>} : memref<16x16xf32, #tpu.memory_space<vmem>>, vector<16x16xf32>,
      %cst_36 = arith.constant 0.000000e+00 : f32
      %34 = vector.broadcast %cst_36 : f32 to vector<16x16xf32>
      %c0_37 = arith.constant 0 : index
      %c0_38 = arith.constant 0 : index
      %35 = vector.load %arg6[%c0_37, %c0_38] : memref<16x16xf32, #tpu.memory_space<vmem>>, vector<16x16xf32>
      tpu.vector_store %arg6[%c0_37, %c0_38], %34 {strides = array<i32>} : memref<16x16xf32, #tpu.memory_space<vmem>>, vector<16x16xf32>,
      %cst_39 = arith.constant 0.000000e+00 : f32
      %36 = vector.broadcast %cst_39 : f32 to vector<1x16xf32>
      %c0_40 = arith.constant 0 : index
      %c0_41 = arith.constant 0 : index
      %37 = vector.load %arg7[%c0_40, %c0_41] : memref<1x16xf32, #tpu.memory_space<vmem>>, vector<1x16xf32>
      tpu.vector_store %arg7[%c0_40, %c0_41], %36 {strides = array<i32>} : memref<1x16xf32, #tpu.memory_space<vmem>>, vector<1x16xf32>,
      %cst_42 = arith.constant 0.000000e+00 : f32
      %38 = vector.broadcast %cst_42 : f32 to vector<1x16xf32>
      %c0_43 = arith.constant 0 : index
      %c0_44 = arith.constant 0 : index
      %39 = vector.load %arg8[%c0_43, %c0_44] : memref<1x16xf32, #tpu.memory_space<vmem>>, vector<1x16xf32>
      tpu.vector_store %arg8[%c0_43, %c0_44], %38 {strides = array<i32>} : memref<1x16xf32, #tpu.memory_space<vmem>>, vector<1x16xf32>,
    } else {
    }
    %c0 = arith.constant 0 : index
    %c0_1 = arith.constant 0 : index
    %3 = vector.load %arg1[%c0, %c0_1] : memref<256x16xf32, #tpu.memory_space<vmem>>, vector<256x16xf32>
    %c0_2 = arith.constant 0 : index
    %c0_3 = arith.constant 0 : index
    %4 = vector.load %arg2[%c0_2, %c0_3] : memref<256x16xf32, #tpu.memory_space<vmem>>, vector<256x16xf32>
    %c0_4 = arith.constant 0 : index
    %c0_5 = arith.constant 0 : index
    %5 = vector.load %arg4[%c0_4, %c0_5] : memref<16x16xf32, #tpu.memory_space<vmem>>, vector<16x16xf32>
    %cst = arith.constant dense<0.000000e+00> : vector<16x16xf32>
    %6 = tpu.matmul %3, %3, %cst {dimension_numbers = #tpu.dot_dimension_numbers<[0], [0], [1], [1], [0, 1, 1, 1], [], []>} : vector<256x16xf32>, vector<256x16xf32>, vector<16x16xf32> -> vector<16x16xf32>
    %7 = arith.addf %5, %6 : vector<16x16xf32>
    %c0_6 = arith.constant 0 : index
    %c0_7 = arith.constant 0 : index
    %8 = vector.load %arg4[%c0_6, %c0_7] : memref<16x16xf32, #tpu.memory_space<vmem>>, vector<16x16xf32>
    tpu.vector_store %arg4[%c0_6, %c0_7], %7 {strides = array<i32>} : memref<16x16xf32, #tpu.memory_space<vmem>>, vector<16x16xf32>,
    %c0_8 = arith.constant 0 : index
    %c0_9 = arith.constant 0 : index
    %9 = vector.load %arg5[%c0_8, %c0_9] : memref<16x16xf32, #tpu.memory_space<vmem>>, vector<16x16xf32>
    %cst_10 = arith.constant dense<0.000000e+00> : vector<16x16xf32>
    %10 = tpu.matmul %3, %4, %cst_10 {dimension_numbers = #tpu.dot_dimension_numbers<[0], [0], [1], [1], [0, 1, 1, 1], [], []>} : vector<256x16xf32>, vector<256x16xf32>, vector<16x16xf32> -> vector<16x16xf32>
    %11 = arith.addf %9, %10 : vector<16x16xf32>
    %c0_11 = arith.constant 0 : index
    %c0_12 = arith.constant 0 : index
    %12 = vector.load %arg5[%c0_11, %c0_12] : memref<16x16xf32, #tpu.memory_space<vmem>>, vector<16x16xf32>
    tpu.vector_store %arg5[%c0_11, %c0_12], %11 {strides = array<i32>} : memref<16x16xf32, #tpu.memory_space<vmem>>, vector<16x16xf32>,
    %c0_13 = arith.constant 0 : index
    %c0_14 = arith.constant 0 : index
    %13 = vector.load %arg6[%c0_13, %c0_14] : memref<16x16xf32, #tpu.memory_space<vmem>>, vector<16x16xf32>
    %cst_15 = arith.constant dense<0.000000e+00> : vector<16x16xf32>
    %14 = tpu.matmul %4, %4, %cst_15 {dimension_numbers = #tpu.dot_dimension_numbers<[0], [0], [1], [1], [0, 1, 1, 1], [], []>} : vector<256x16xf32>, vector<256x16xf32>, vector<16x16xf32> -> vector<16x16xf32>
    %15 = arith.addf %13, %14 : vector<16x16xf32>
    %c0_16 = arith.constant 0 : index
    %c0_17 = arith.constant 0 : index
    %16 = vector.load %arg6[%c0_16, %c0_17] : memref<16x16xf32, #tpu.memory_space<vmem>>, vector<16x16xf32>
    tpu.vector_store %arg6[%c0_16, %c0_17], %15 {strides = array<i32>} : memref<16x16xf32, #tpu.memory_space<vmem>>, vector<16x16xf32>,
    %c0_18 = arith.constant 0 : index
    %c0_19 = arith.constant 0 : index
    %17 = vector.load %arg7[%c0_18, %c0_19] : memref<1x16xf32, #tpu.memory_space<vmem>>, vector<1x16xf32>
    %cst_20 = arith.constant dense<0.000000e+00> : vector<16xf32>
    %18 = vector.multi_reduction <add>, %3, %cst_20 [0] : vector<256x16xf32> to vector<16xf32>
    %19 = vector.shape_cast %18 : vector<16xf32> to vector<1x16xf32>
    %20 = arith.addf %17, %19 : vector<1x16xf32>
    %c0_21 = arith.constant 0 : index
    %c0_22 = arith.constant 0 : index
    %21 = vector.load %arg7[%c0_21, %c0_22] : memref<1x16xf32, #tpu.memory_space<vmem>>, vector<1x16xf32>
    tpu.vector_store %arg7[%c0_21, %c0_22], %20 {strides = array<i32>} : memref<1x16xf32, #tpu.memory_space<vmem>>, vector<1x16xf32>,
    %c0_23 = arith.constant 0 : index
    %c0_24 = arith.constant 0 : index
    %22 = vector.load %arg8[%c0_23, %c0_24] : memref<1x16xf32, #tpu.memory_space<vmem>>, vector<1x16xf32>
    %cst_25 = arith.constant dense<0.000000e+00> : vector<16xf32>
    %23 = vector.multi_reduction <add>, %4, %cst_25 [0] : vector<256x16xf32> to vector<16xf32>
    %24 = vector.shape_cast %23 : vector<16xf32> to vector<1x16xf32>
    %25 = arith.addf %22, %24 : vector<1x16xf32>
    %c0_26 = arith.constant 0 : index
    %c0_27 = arith.constant 0 : index
    %26 = vector.load %arg8[%c0_26, %c0_27] : memref<1x16xf32, #tpu.memory_space<vmem>>, vector<1x16xf32>
    tpu.vector_store %arg8[%c0_26, %c0_27], %25 {strides = array<i32>} : memref<1x16xf32, #tpu.memory_space<vmem>>, vector<1x16xf32>,
    %c0_i32_28 = arith.constant 0 : i32
    %27 = arith.cmpi eq, %arg0, %c0_i32_28 : i32
    %28 = arith.extui %27 : i1 to i32
    %c0_i32_29 = arith.constant 0 : i32
    %29 = arith.cmpi ne, %28, %c0_i32_29 : i32
    scf.if %29 {
      %c0_30 = arith.constant 0 : index
      %c0_31 = arith.constant 0 : index
      %30 = vector.load %arg7[%c0_30, %c0_31] : memref<1x16xf32, #tpu.memory_space<vmem>>, vector<1x16xf32>
      %c0_32 = arith.constant 0 : index
      %c0_33 = arith.constant 0 : index
      %31 = vector.load %arg8[%c0_32, %c0_33] : memref<1x16xf32, #tpu.memory_space<vmem>>, vector<1x16xf32>
      %cst_34 = arith.constant dense<0.000000e+00> : vector<1xf32>
      %32 = vector.multi_reduction <add>, %30, %cst_34 [1] : vector<1x16xf32> to vector<1xf32>
      %33 = vector.shape_cast %32 : vector<1xf32> to vector<1x1xf32>
      %34 = vector.broadcast %33 : vector<1x1xf32> to vector<1x16xf32>
      %35 = arith.divf %30, %34 : vector<1x16xf32>
      %cst_35 = arith.constant dense<0.000000e+00> : vector<1xf32>
      %36 = vector.multi_reduction <add>, %31, %cst_35 [1] : vector<1x16xf32> to vector<1xf32>
      %37 = vector.shape_cast %36 : vector<1xf32> to vector<1x1xf32>
      %38 = vector.broadcast %37 : vector<1x1xf32> to vector<1x16xf32>
      %39 = arith.divf %31, %38 : vector<1x16xf32>
      %cst_36 = arith.constant 9.99999993E-9 : f32
      %40 = vector.broadcast %cst_36 : f32 to vector<1x16xf32>
      %41 = arith.addf %35, %40 : vector<1x16xf32>
      %42 = math.log %41 : vector<1x16xf32>
      %43 = arith.mulf %35, %42 : vector<1x16xf32>
      %cst_37 = arith.constant dense<0.000000e+00> : vector<1xf32>
      %44 = vector.multi_reduction <add>, %43, %cst_37 [1] : vector<1x16xf32> to vector<1xf32>
      %45 = vector.shape_cast %44 : vector<1xf32> to vector<1x1xf32>
      %cst_38 = arith.constant 2.77258873 : f32
      %46 = vector.broadcast %cst_38 : f32 to vector<1x1xf32>
      %47 = arith.addf %46, %45 : vector<1x1xf32>
      %cst_39 = arith.constant 9.99999993E-9 : f32
      %48 = vector.broadcast %cst_39 : f32 to vector<1x16xf32>
      %49 = arith.addf %39, %48 : vector<1x16xf32>
      %50 = math.log %49 : vector<1x16xf32>
      %51 = arith.mulf %39, %50 : vector<1x16xf32>
      %cst_40 = arith.constant dense<0.000000e+00> : vector<1xf32>
      %52 = vector.multi_reduction <add>, %51, %cst_40 [1] : vector<1x16xf32> to vector<1xf32>
      %53 = vector.shape_cast %52 : vector<1xf32> to vector<1x1xf32>
      %cst_41 = arith.constant 2.77258873 : f32
      %54 = vector.broadcast %cst_41 : f32 to vector<1x1xf32>
      %55 = arith.addf %54, %53 : vector<1x1xf32>
      %56 = arith.addf %47, %55 : vector<1x1xf32>
      %c0_42 = arith.constant 0 : index
      %c0_43 = arith.constant 0 : index
      %57 = vector.load %arg4[%c0_42, %c0_43] : memref<16x16xf32, #tpu.memory_space<vmem>>, vector<16x16xf32>
      %c0_44 = arith.constant 0 : index
      %c0_45 = arith.constant 0 : index
      %58 = vector.load %arg5[%c0_44, %c0_45] : memref<16x16xf32, #tpu.memory_space<vmem>>, vector<16x16xf32>
      %c0_46 = arith.constant 0 : index
      %c0_47 = arith.constant 0 : index
      %59 = vector.load %arg6[%c0_46, %c0_47] : memref<16x16xf32, #tpu.memory_space<vmem>>, vector<16x16xf32>
      %60 = tpu.concatenate %57, %58 in 1 : vector<16x16xf32>, vector<16x16xf32> -> vector<16x32xf32>
      %61 = tpu.transpose %58, [1, 0] : vector<16x16xf32> -> vector<16x16xf32>
      %62 = tpu.concatenate %61, %59 in 1 : vector<16x16xf32>, vector<16x16xf32> -> vector<16x32xf32>
      %63 = tpu.concatenate %60, %62 in 0 : vector<16x32xf32>, vector<16x32xf32> -> vector<32x32xf32>
      %64 = tpu.iota {dimensions = array<i32: 0>} : vector<32x32xi32>
      %65 = tpu.iota {dimensions = array<i32: 1>} : vector<32x32xi32>
      %66 = arith.cmpi eq, %64, %65 : vector<32x32xi32>
      %cst_48 = arith.constant 0.000000e+00 : f32
      %67 = vector.broadcast %cst_48 : f32 to vector<32x32xf32>
      %68 = arith.select %66, %63, %67 : vector<32x32xi1>, vector<32x32xf32>
      %cst_49 = arith.constant dense<0.000000e+00> : vector<32xf32>
      %69 = vector.multi_reduction <add>, %68, %cst_49 [1] : vector<32x32xf32> to vector<32xf32>
      %70 = vector.shape_cast %69 : vector<32xf32> to vector<32x1xf32>
      %cst_50 = arith.constant dense<0.000000e+00> : vector<32xf32>
      %71 = vector.multi_reduction <add>, %68, %cst_50 [0] : vector<32x32xf32> to vector<32xf32>
      %72 = vector.shape_cast %71 : vector<32xf32> to vector<1x32xf32>
      %cst_51 = arith.constant 1.000000e-16 : f32
      %73 = vector.broadcast %cst_51 : f32 to vector<32x1xf32>
      %74 = arith.maximumf %70, %73 : vector<32x1xf32>
      %75 = math.rsqrt %74 : vector<32x1xf32>
      %cst_52 = arith.constant 2.000000e+00 : f32
      %76 = vector.broadcast %cst_52 : f32 to vector<32x1xf32>
      %77 = arith.mulf %75, %76 : vector<32x1xf32>
      %cst_53 = arith.constant 1.000000e-16 : f32
      %78 = vector.broadcast %cst_53 : f32 to vector<1x32xf32>
      %79 = arith.maximumf %72, %78 : vector<1x32xf32>
      %80 = math.rsqrt %79 : vector<1x32xf32>
      %81 = vector.broadcast %80 : vector<1x32xf32> to vector<32x32xf32>
      %82 = arith.mulf %63, %81 : vector<32x32xf32>
      %83 = vector.broadcast %77 : vector<32x1xf32> to vector<32x32xf32>
      %84 = arith.mulf %82, %83 : vector<32x32xf32>
      %c16_i32 = arith.constant 16 : i32
      %85 = vector.broadcast %c16_i32 : i32 to vector<32x32xi32>
      %86 = arith.cmpi slt, %64, %85 : vector<32x32xi32>
      %c16_i32_54 = arith.constant 16 : i32
      %87 = vector.broadcast %c16_i32_54 : i32 to vector<32x32xi32>
      %88 = arith.addi %64, %87 : vector<32x32xi32>
      %c16_i32_55 = arith.constant 16 : i32
      %89 = vector.broadcast %c16_i32_55 : i32 to vector<32x32xi32>
      %90 = arith.subi %64, %89 : vector<32x32xi32>
      %91 = arith.select %86, %88, %90 : vector<32x32xi1>, vector<32x32xi32>
      %92 = arith.cmpi eq, %65, %91 : vector<32x32xi32>
      %cst_56 = arith.constant 0.000000e+00 : f32
      %93 = vector.broadcast %cst_56 : f32 to vector<32x32xf32>
      %94 = arith.select %92, %84, %93 : vector<32x32xi1>, vector<32x32xf32>
      %cst_57 = arith.constant dense<0.000000e+00> : vector<32xf32>
      %95 = vector.multi_reduction <add>, %94, %cst_57 [1] : vector<32x32xf32> to vector<32xf32>
      %96 = vector.shape_cast %95 : vector<32xf32> to vector<32x1xf32>
      %cst_58 = arith.constant 0xFF800000 : f32
      %97 = vector.broadcast %cst_58 : f32 to vector<32x32xf32>
      %98 = arith.select %66, %97, %84 : vector<32x32xi1>, vector<32x32xf32>
      %cst_59 = arith.constant dense<0xFF800000> : vector<32xf32>
      %99 = vector.multi_reduction <maximumf>, %98, %cst_59 [1] : vector<32x32xf32> to vector<32xf32>
      %100 = vector.shape_cast %99 : vector<32xf32> to vector<32x1xf32>
      %101 = arith.subf %96, %100 : vector<32x1xf32>
      %102 = math.exp %101 : vector<32x1xf32>
      %103 = vector.broadcast %100 : vector<32x1xf32> to vector<32x32xf32>
      %104 = arith.subf %84, %103 : vector<32x32xf32>
      %105 = math.exp %104 : vector<32x32xf32>
      %cst_60 = arith.constant 0.000000e+00 : f32
      %106 = vector.broadcast %cst_60 : f32 to vector<32x32xf32>
      %107 = arith.select %66, %106, %105 : vector<32x32xi1>, vector<32x32xf32>
      %cst_61 = arith.constant dense<0.000000e+00> : vector<32xf32>
      %108 = vector.multi_reduction <add>, %107, %cst_61 [1] : vector<32x32xf32> to vector<32xf32>
      %109 = vector.shape_cast %108 : vector<32xf32> to vector<32x1xf32>
      %110 = arith.addf %102, %109 : vector<32x1xf32>
      %111 = math.log %110 : vector<32x1xf32>
      %112 = arith.addf %100, %111 : vector<32x1xf32>
      %113 = arith.subf %112, %96 : vector<32x1xf32>
      %cst_62 = arith.constant dense<0.000000e+00> : vector<1xf32>
      %114 = vector.multi_reduction <add>, %113, %cst_62 [0] : vector<32x1xf32> to vector<1xf32>
      %115 = vector.shape_cast %114 : vector<1xf32> to vector<1x1xf32>
      %cst_63 = arith.constant 3.200000e+01 : f32
      %116 = vector.broadcast %cst_63 : f32 to vector<1x1xf32>
      %117 = arith.divf %115, %116 : vector<1x1xf32>
      %118 = arith.addf %117, %56 : vector<1x1xf32>
      %c0_64 = arith.constant 0 : index
      %c0_65 = arith.constant 0 : index
      %119 = vector.load %arg3[%c0_64, %c0_65] : memref<1x1xf32, #tpu.memory_space<vmem>>, vector<1x1xf32>
      tpu.vector_store %arg3[%c0_64, %c0_65], %118 {strides = array<i32>} : memref<1x1xf32, #tpu.memory_space<vmem>>, vector<1x1xf32>,
    } else {
    }
    return
  }
  func.func @transform_0(%arg0: i32) -> (i32, i32) {
    %c0_i32 = arith.constant 0 : i32
    %c0_i32_0 = arith.constant 0 : i32
    return %arg0, %c0_i32 : i32, i32
  }
  func.func @transform_1(%arg0: i32) -> (i32, i32) {
    %c0_i32 = arith.constant 0 : i32
    %c0_i32_0 = arith.constant 0 : i32
    return %arg0, %c0_i32 : i32, i32
  }
  func.func @transform_2(%arg0: i32) -> (i32, i32) {
    %c0_i32 = arith.constant 0 : i32
    %c0_i32_0 = arith.constant 0 : i32
    %c0_i32_1 = arith.constant 0 : i32
    return %c0_i32, %c0_i32_0 : i32, i32
  }
}

</mosaic_0001>

<bundles_post_ra>
// kernel: tpu_custom_call.1
= control target key start
LH: loop header
LB: loop body
LE: loop exit
PB: predicated region body
PF: predicated region fallthrough
CT: control target
= control target key end

     0   :  { %vm16_vm0 = vcmask 130048   ;;  %vm23_vm1 = vcmask 122880   ;;  %v1276_v7 = vmov 0.0   ;;  %s2052_s0 = inlined_call_operand.vmem [shape: f32[256,16], index: 0, kind: input, shape index: {}]   ;;  %s2053_s1 = inlined_call_operand.vmem [shape: f32[256,16], index: 1, kind: input, shape index: {}]   ;;  %s2054_s2 = inlined_call_operand.hbm [shape: f32[1,1], index: 2, kind: output, shape index: {}]  }
   0x1   :  { %v1297_v0 = vld [vmem:[%s2052_s0] sm:$0xff]  ;;  %v1307_v2 = vld [vmem:[%s2052_s0 + $0x8] sm:$0xff]  ;;  %24 = vst.msk [vmem:[#allocation5] sm:$0x1] %vm23_vm1, %v1276_v7  ;;  %25 = vst.msk [vmem:[#allocation6] sm:$0x1] %vm23_vm1, %v1276_v7 }
   0x2   :  { %v1302_v1 = vld [vmem:[%s2052_s0 + $0x80] sm:$0xff]  ;;  %v463_v4 = vsel %vm16_vm0, %v1297_v0, 0.0  ;;  %v1316_v5 = vld [vmem:[%s2052_s0 + $0x88] sm:$0xff]  ;;  %v464_v6 = vsel %vm16_vm0, %v1307_v2, 0.0  ;;  %17 = vst.msk [vmem:[#allocation2] sm:$0xff] %vm16_vm0, %v1276_v7  ;;  %18 = vst.msk [vmem:[#allocation2 + $0x8] sm:$0xff] %vm16_vm0, %v1276_v7 }
   0x3   :  { %v1126_v3 = vpack.i.bf16 %v1297_v0, %v1302_v1  ;;  %19 = vst.msk [vmem:[#allocation3] sm:$0xff] %vm16_vm0, %v1276_v7  ;;  %20 = vst.msk [vmem:[#allocation3 + $0x8] sm:$0xff] %vm16_vm0, %v1276_v7  ;;  %v465_v8 = vadd.f32 %v464_v6, %v463_v4  ;;  %v1331_v9 = vld [vmem:[%s2052_s0 + $0x10] sm:$0xff]  ;;  %v1336_v10 = vld [vmem:[%s2052_s0 + $0x18] sm:$0xff]  ;;  %v1128_v11 = vpack.i.bf16 %v1307_v2, %v1316_v5 }
   0x4   :  { %21 = vst.msk [vmem:[#allocation4] sm:$0xff] %vm16_vm0, %v1276_v7  ;;  %22 = vst.msk [vmem:[#allocation4 + $0x8] sm:$0xff] %vm16_vm0, %v1276_v7  ;;  %v466_v12 = vsel %vm16_vm0, %v1331_v9, 0.0  ;;  %v468_v13 = vsel %vm16_vm0, %v1336_v10, 0.0  ;;  %v1347_v14 = vld [vmem:[%s2052_s0 + $0x90] sm:$0xff]  ;;  %v1352_v16 = vld [vmem:[%s2052_s0 + $0x20] sm:$0xff] }
   0x5   :  { %1127 = vxpose.xlu0.b32.start [1/16] (narrow) %v1126_v3, 16  ;;  %v467_v15 = vadd.f32 %v466_v12, %v465_v8  ;;  %v470_v17 = vsel %vm16_vm0, %v1352_v16, 0.0  ;;  %v1359_v18 = vld [vmem:[%s2053_s1] sm:$0xff]  ;;  %v1364_v20 = vld [vmem:[%s2052_s0 + $0x28] sm:$0xff]  ;;  %v1130_v22 = vpack.i.bf16 %v1331_v9, %v1347_v14  ;;  %v1390_v27 = vld [vmem:[%s2052_s0 + $0x98] sm:$0xff] }
   0x6   :  { %v1369_v21 = vld [vmem:[%s2053_s1 + $0x80] sm:$0xff]  ;;  %v472_v23 = vsel %vm16_vm0, %v1364_v20, 0.0  ;;  %v1380_v25 = vld [vmem:[%s2053_s1 + $0x8] sm:$0xff]  ;;  %v1395_v29 = vld [vmem:[%s2052_s0 + $0x30] sm:$0xff]  ;;  %v536_v30 = vsel %vm16_vm0, %v1359_v18, 0.0  ;;  %v1132_v39 = vpack.i.bf16 %v1336_v10, %v1390_v27 }
   0x7   :  { %v469_v19 = vadd.f32 %v468_v13, %v467_v15  ;;  %v1168_v24 = vpack.i.bf16 %v1359_v18, %v1369_v21  ;;  %v1385_v26 = vld [vmem:[%s2053_s1 + $0x88] sm:$0xff]  ;;  %v474_v31 = vsel %vm16_vm0, %v1395_v29, 0.0  ;;  %v537_v33 = vsel %vm16_vm0, %v1380_v25, 0.0  ;;  %v1408_v35 = vld [vmem:[%s2052_s0 + $0x38] sm:$0xff]  ;;  %v1413_v37 = vld [vmem:[%s2053_s1 + $0x10] sm:$0xff] }
   0x8   :  { %v1170_v32 = vpack.i.bf16 %v1380_v25, %v1385_v26  ;;  %v538_v36 = vadd.f32 %v537_v33, %v536_v30  ;;  %v1418_v38 = vld [vmem:[%s2053_s1 + $0x90] sm:$0xff]  ;;  %v476_v40 = vsel %vm16_vm0, %v1408_v35, 0.0  ;;  %v539_v41 = vsel %vm16_vm0, %v1413_v37, 0.0  ;;  %v1429_v42 = vld [vmem:[%s2052_s0 + $0xa0] sm:$0xff]  ;;  %v1439_v46 = vld [vmem:[%s2053_s1 + $0x18] sm:$0xff] }
   0x9   :  { %1129 = vxpose.xlu0.b32.cont [2/16] (narrow) %v1128_v11, 16  ;;  %v471_v28 = vadd.f32 %v470_v17, %v469_v19  ;;  %1169 = vxpose.xlu1.b32.start [1/16] (narrow) %v1168_v24, 16  ;;  %v1434_v44 = vld [vmem:[%s2052_s0 + $0x40] sm:$0xff]  ;;  %v1172_v48 = vpack.i.bf16 %v1413_v37, %v1418_v38  ;;  %v541_v49 = vsel %vm16_vm0, %v1439_v46, 0.0  ;;  %v1450_v51 = vld [vmem:[%s2052_s0 + $0x48] sm:$0xff]  ;;  %v1455_v52 = vld [vmem:[%s2053_s1 + $0x98] sm:$0xff]  ;;  %v1134_v55 = vpack.i.bf16 %v1352_v16, %v1429_v42 }
   0xa   :  { %v540_v45 = vadd.f32 %v539_v41, %v538_v36  ;;  %v478_v47 = vsel %vm16_vm0, %v1434_v44, 0.0  ;;  %v1460_v54 = vld [vmem:[%s2053_s1 + $0x20] sm:$0xff]  ;;  %v480_v56 = vsel %vm16_vm0, %v1450_v51, 0.0  ;;  %v1471_v58 = vld [vmem:[%s2052_s0 + $0xa8] sm:$0xff]  ;;  %v1476_v60 = vld [vmem:[%s2052_s0 + $0x50] sm:$0xff]  ;;  %v1174_v3 = vpack.i.bf16 %v1439_v46, %v1455_v52 }
   0xb   :  { %v473_v34 = vadd.f32 %v472_v23, %v471_v28  ;;  %v543_v57 = vsel %vm16_vm0, %v1460_v54, 0.0  ;;  %v1481_v62 = vld [vmem:[%s2053_s1 + $0x28] sm:$0xff]  ;;  %v482_v63 = vsel %vm16_vm0, %v1476_v60, 0.0  ;;  %v1492_v7 = vld [vmem:[%s2052_s0 + $0x58] sm:$0xff]  ;;  %v1497_v8 = vld [vmem:[%s2053_s1 + $0xa0] sm:$0xff]  ;;  %v1136_v13 = vpack.i.bf16 %v1364_v20, %v1471_v58 }
   0xc   :  { %v542_v53 = vadd.f32 %v541_v49, %v540_v45  ;;  %v545_v4 = vsel %vm16_vm0, %v1481_v62, 0.0  ;;  %v1502_v12 = vld [vmem:[%s2053_s1 + $0x30] sm:$0xff]  ;;  %v484_v15 = vsel %vm16_vm0, %v1492_v7, 0.0  ;;  %v1518_v23 = vld [vmem:[%s2052_s0 + $0x60] sm:$0xff]  ;;  %v1523_v28 = vld [vmem:[%s2053_s1 + $0x38] sm:$0xff]  ;;  %v1176_v30 = vpack.i.bf16 %v1460_v54, %v1497_v8 }
   0xd   :  { %1131 = vxpose.xlu0.b32.cont [3/16] (narrow) %v1130_v22, 16  ;;  %v475_v43 = vadd.f32 %v474_v31, %v473_v34  ;;  %1171 = vxpose.xlu1.b32.cont [2/16] (narrow) %v1170_v32, 16  ;;  %v547_v17 = vsel %vm16_vm0, %v1502_v12, 0.0  ;;  %v1513_v19 = vld [vmem:[%s2052_s0 + $0xb0] sm:$0xff]  ;;  %v486_v31 = vsel %vm16_vm0, %v1518_v23, 0.0  ;;  %v549_v32 = vsel %vm16_vm0, %v1523_v28, 0.0 }
   0xe   :  { %v544_v61 = vadd.f32 %v543_v57, %v542_v53  ;;  %v1534_v34 = vld [vmem:[%s2053_s1 + $0xa8] sm:$0xff]  ;;  %v1138_v41 = vpack.i.bf16 %v1395_v29, %v1513_v19  ;;  %v1560_v49 = vld [vmem:[%s2052_s0 + $0x70] sm:$0xff] }
   0xf   :  { %v477_v50 = vadd.f32 %v476_v40, %v475_v43  ;;  %v1539_v36 = vld [vmem:[%s2052_s0 + $0x68] sm:$0xff]  ;;  %v1544_v40 = vld [vmem:[%s2053_s1 + $0x40] sm:$0xff]  ;;  %v1551_v43 = vld [vmem:[%s2052_s0 + $0xb8] sm:$0xff]  ;;  %v490_v57 = vsel %vm16_vm0, %v1560_v49, 0.0 }
  0x10   :  { %v546_v11 = vadd.f32 %v545_v4, %v544_v61  ;;  %v488_v45 = vsel %vm16_vm0, %v1539_v36, 0.0  ;;  %v1565_v53 = vld [vmem:[%s2053_s1 + $0x48] sm:$0xff] }
  0x11   :  { %1133 = vxpose.xlu0.b32.cont [4/16] (narrow) %v1132_v39, 16  ;;  %v479_v59 = vadd.f32 %v478_v47, %v477_v50  ;;  %1173 = vxpose.xlu1.b32.cont [3/16] (narrow) %v1172_v48, 16  ;;  %v551_v47 = vsel %vm16_vm0, %v1544_v40, 0.0 }
  0x12   :  { %v548_v24 = vadd.f32 %v547_v17, %v546_v11 }
  0x13   :  { %v481_v6 = vadd.f32 %v480_v56, %v479_v59  ;;  %v1178_v56 = vpack.i.bf16 %v1481_v62, %v1534_v34  ;;  %v553_v59 = vsel %vm16_vm0, %v1565_v53, 0.0 }
  0x14   :  { %v550_v39 = vadd.f32 %v549_v32, %v548_v24 }
  0x15   :  { %1135 = vxpose.xlu0.b32.cont [5/16] (narrow) %v1134_v55, 16  ;;  %v483_v22 = vadd.f32 %v482_v63, %v481_v6  ;;  %1175 = vxpose.xlu1.b32.cont [4/16] (narrow) %v1174_v3, 16  ;;  %v1570_v55 = vld [vmem:[%s2053_s1 + $0x50] sm:$0xff] }
  0x16   :  { %v552_v50 = vadd.f32 %v551_v47, %v550_v39  ;;  %v555_v61 = vsel %vm16_vm0, %v1570_v55, 0.0 }
  0x17   :  { %v485_v33 = vadd.f32 %v484_v15, %v483_v22 }
  0x19   :  { %1137 = vxpose.xlu0.b32.cont [6/16] (narrow) %v1136_v13, 16  ;;  %v487_v48 = vadd.f32 %v486_v31, %v485_v33  ;;  %1177 = vxpose.xlu1.b32.cont [5/16] (narrow) %v1176_v30, 16 }
  0x1a   :  { %7 = vsyncpa [#allocation8], 0  ;;  %v1583_v3 = vld [vmem:[%s2053_s1 + $0xb0] sm:$0xff]  ;;  %v1588_v4 = vld [vmem:[%s2052_s0 + $0x78] sm:$0xff]  ;;  %v554_v6 = vadd.f32 %v553_v59, %v552_v50  ;;  %v1140_v13 = vpack.i.bf16 %v1408_v35, %v1551_v43  ;;  %v494_v32 = vsel %vm16_vm0, %v1302_v1, 0.0  ;;  %vm712_vm3 = vcmask 261120  }
  0x1b   :  { %v489_v63 = vadd.f32 %v488_v45, %v487_v48  ;;  %v1593_v11 = vld [vmem:[%s2053_s1 + $0x58] sm:$0xff]  ;;  %v492_v15 = vsel %vm16_vm0, %v1588_v4, 0.0  ;;  %v1604_v22 = vld [vmem:[%s2052_s0 + $0xc0] sm:$0xff]  ;;  %v1180_v33 = vpack.i.bf16 %v1502_v12, %v1583_v3  ;;  %v498_v45 = vsel %vm16_vm0, %v1347_v14, 0.0 }
  0x1c   :  { %v557_v17 = vsel %vm16_vm0, %v1593_v11, 0.0  ;;  %v556_v30 = vadd.f32 %v555_v61, %v554_v6  ;;  %v1609_v31 = vld [vmem:[%s2053_s1 + $0x60] sm:$0xff]  ;;  %v1624_v47 = vld [vmem:[%s2053_s1 + $0xb8] sm:$0xff]  ;;  %v1011_v61 = vpack.c.bf16 %v1316_v5, %v1302_v1  ;;  %v1642_v6 = vld [vmem:[%s2052_s0 + $0xc8] sm:$0xff]  ;;  %v1655_v1 = vpack.c.bf16 %v1380_v25, %v1359_v18 }
  0x1d   :  { %1139 = vxpose.xlu0.b32.cont [7/16] (narrow) %v1138_v41, 16  ;;  %v491_v24 = vadd.f32 %v490_v57, %v489_v63  ;;  %1179 = vxpose.xlu1.b32.cont [6/16] (narrow) %v1178_v56, 16  ;;  %v559_v39 = vsel %vm16_vm0, %v1609_v31, 0.0  ;;  %v496_v41 = vsel %vm16_vm0, %v1316_v5, 0.0  ;;  %v1629_v56 = vld [vmem:[%s2053_s1 + $0x68] sm:$0xff]  ;;  %v1142_v57 = vpack.i.bf16 %v1434_v44, %v1604_v22  ;;  %v1672_v25 = vld [vmem:[%s2053_s1 + $0xc0] sm:$0xff] }
  0x1e   :  { %v558_v50 = vadd.f32 %v557_v17, %v556_v30  ;;  %v561_v59 = vsel %vm16_vm0, %v1629_v56, 0.0  ;;  %v1013_v63 = vpack.c.bf16 %v1307_v2, %v1297_v0  ;;  %v1182_v0 = vpack.i.bf16 %v1523_v28, %v1624_v47  ;;  %1012 = vmatprep.subr.bf16.mxu0 %v1011_v61 }
  0x1f   :  { %v493_v48 = vadd.f32 %v492_v15, %v491_v24  ;;  %v1651_v24 = vpack.c.bf16 %v1385_v26, %v1369_v21  ;;  %v1015_v5 = vpack.c.bf16 %v1390_v27, %v1347_v14  ;;  %v1665_v30 = vpack.c.bf16 %v1455_v52, %v1418_v38 }
  0x20   :  { %v560_v17 = vadd.f32 %v559_v39, %v558_v50  ;;  %v1677_v39 = vld [vmem:[%s2053_s1 + $0x78] sm:$0xff]  ;;  %1014 = vmatpush3.bf16.msra.mxu0 %v1013_v63  ;;  %v1017_v14 = vpack.c.bf16 %v1336_v10, %v1331_v9  ;;  %v1019_v50 = vpack.c.bf16 %v1471_v58, %v1429_v42  ;;  %v1696_v9 = vld [vmem:[%s2052_s0 + $0xd0] sm:$0xff]  ;;  %v1184_v61 = vpack.i.bf16 %v1544_v40, %v1672_v25 }
  0x21   :  { %1141 = vxpose.xlu0.b32.cont [8/16] (narrow) %v1140_v13, 16  ;;  %v495_v15 = vadd.f32 %v494_v32, %v493_v48  ;;  %v1647_v13 = vld [vmem:[%s2053_s1 + $0x70] sm:$0xff]  ;;  %1181 = vxpose.xlu1.b32.cont [7/16] (narrow) %v1180_v33, 16  ;;  %v500_v32 = vsel %vm16_vm0, %v1390_v27, 0.0  ;;  %v1144_v27 = vpack.i.bf16 %v1450_v51, %v1642_v6  ;;  %v1689_v48 = vpack.c.bf16 %v1439_v46, %v1413_v37 }
  0x22   :  { %v563_v2 = vsel %vm16_vm0, %v1647_v13, 0.0  ;;  %v562_v33 = vadd.f32 %v561_v59, %v560_v17  ;;  %1044 = vmatprep.subr.bf16.mxu1 %v1651_v24  ;;  %1016 = vmatprep.subr.bf16.mxu0 %v1015_v5  ;;  %v1701_v59 = vpack.c.bf16 %v1534_v34, %v1497_v8  ;;  %v502_v37 = vsel %vm16_vm0, %v1429_v42, 0.0 }
  0x23   :  { %v497_v18 = vadd.f32 %v496_v41, %v495_v15  ;;  %v565_v41 = vsel %vm16_vm0, %v1677_v39, 0.0  ;;  %1046 = vmatpush3.bf16.msra.mxu1 %v1655_v1  ;;  %v567_v46 = vsel %vm16_vm0, %v1369_v21, 0.0  ;;  %v1714_v15 = vld [vmem:[%s2053_s1 + $0xc8] sm:$0xff]  ;;  %v1021_v42 = vpack.c.bf16 %v1364_v20, %v1352_v16  ;;  %v1732_v16 = vld [vmem:[%s2052_s0 + $0xd8] sm:$0xff] }
  0x24   :  { %1048 = vmatprep.subr.bf16.mxu1 %v1665_v30  ;;  %1018 = vmatpush3.bf16.msra.mxu0 %v1017_v14  ;;  %v569_v21 = vsel %vm16_vm0, %v1385_v26, 0.0  ;;  %v1737_v5 = vpack.c.bf16 %v1624_v47, %v1583_v3  ;;  %v1750_v14 = vld [vmem:[%s2053_s1 + $0xd0] sm:$0xff]  ;;  %vm878_vm11 = vcmask 0  }
  0x25   :  { %1143 = vxpose.xlu0.b32.cont [9/16] (narrow) %v1142_v57, 16  ;;  %v499_v10 = vadd.f32 %v498_v45, %v497_v18  ;;  %v564_v57 = vadd.f32 %v563_v2, %v562_v33  ;;  %1183 = vxpose.xlu1.b32.cont [8/16] (narrow) %v1182_v0, 16  ;;  %v504_v45 = vsel %vm16_vm0, %v1471_v58, 0.0  ;;  %v1146_v0 = vpack.i.bf16 %v1476_v60, %v1696_v9 }
  0x26   :  { %v1725_v58 = vpack.c.bf16 %v1481_v62, %v1460_v54  ;;  %v1023_v2 = vpack.c.bf16 %v1551_v43, %v1513_v19  ;;  %1020 = vmatprep.subr.bf16.mxu0 %v1019_v50  ;;  %v506_v54 = vsel %vm16_vm0, %v1513_v19, 0.0  ;;  %v571_v62 = vsel %vm16_vm0, %v1418_v38, 0.0 }
  0x27   :  { %v501_v63 = vadd.f32 %v500_v32, %v499_v10  ;;  %v566_v17 = vadd.f32 %v565_v41, %v564_v57  ;;  %1050 = vmatpush3.bf16.msra.mxu1 %v1689_v48  ;;  %v1186_v32 = vpack.i.bf16 %v1565_v53, %v1714_v15  ;;  %v508_v18 = vsel %vm16_vm0, %v1551_v43, 0.0 }
  0x28   :  { %1052 = vmatprep.subr.bf16.mxu1 %v1701_v59  ;;  %1022 = vmatpush3.bf16.msra.mxu0 %v1021_v42  ;;  %v1025_v19 = vpack.c.bf16 %v1408_v35, %v1395_v29  ;;  %v573_v38 = vsel %vm16_vm0, %v1455_v52, 0.0  ;;  %v1148_v41 = vpack.i.bf16 %v1492_v7, %v1732_v16  ;;  %v1761_v43 = vpack.c.bf16 %v1523_v28, %v1502_v12  ;;  %v1768_v29 = vld [vmem:[%s2052_s0 + $0xe0] sm:$0xff] }
  0x29   :  { %1145 = vxpose.xlu0.b32.cont [10/16] (narrow) %v1144_v27, 16  ;;  %v503_v20 = vadd.f32 %v502_v37, %v501_v63  ;;  %v568_v26 = vadd.f32 %v567_v46, %v566_v17  ;;  %1185 = vxpose.xlu1.b32.cont [9/16] (narrow) %v1184_v61, 16  ;;  %v1027_v50 = vpack.c.bf16 %v1642_v6, %v1604_v22  ;;  %v510_v12 = vsel %vm16_vm0, %v1604_v22, 0.0  ;;  %v1786_v61 = vld [vmem:[%s2053_s1 + $0xd8] sm:$0xff] }
  0x2a   :  { %1024 = vmatprep.subr.bf16.mxu0 %v1023_v2  ;;  %v1773_v52 = vpack.c.bf16 %v1714_v15, %v1672_v25  ;;  %v575_v28 = vsel %vm16_vm0, %v1497_v8, 0.0  ;;  %v1188_v57 = vpack.i.bf16 %v1570_v55, %v1750_v14  ;;  %v512_v37 = vsel %vm16_vm0, %v1642_v6, 0.0 }
  0x2b   :  { %v505_v33 = vadd.f32 %v504_v45, %v503_v20  ;;  %v570_v27 = vadd.f32 %v569_v21, %v568_v26  ;;  %1054 = vmatpush3.bf16.msra.mxu1 %v1725_v58  ;;  %v1029_v22 = vpack.c.bf16 %v1450_v51, %v1434_v44  ;;  %v1150_v8 = vpack.i.bf16 %v1518_v23, %v1768_v29  ;;  %v55_v44 = vld [vmem:[%s2052_s0 + $0xe8] sm:$0xff]  ;;  %v86_v20 = vld [vmem:[%s2053_s1 + $0xe0] sm:$0xff] }
  0x2c   :  { %1056 = vmatprep.subr.bf16.mxu1 %v1737_v5  ;;  %1026 = vmatpush3.bf16.msra.mxu0 %v1025_v19  ;;  %v577_v63 = vsel %vm16_vm0, %v1534_v34, 0.0  ;;  %v1797_v6 = vpack.c.bf16 %v1565_v53, %v1544_v40  ;;  %v1031_v17 = vpack.c.bf16 %v1732_v16, %v1696_v9  ;;  %v1807_v34 = vpack.c.bf16 %v1786_v61, %v1750_v14  ;;  %v57_v19 = vld [vmem:[%s2052_s0 + $0xf8] sm:$0xff] }
  0x2d   :  { %1147 = vxpose.xlu0.b32.cont [11/16] (narrow) %v1146_v0, 16  ;;  %v507_v35 = vadd.f32 %v506_v54, %v505_v33  ;;  %v572_v10 = vadd.f32 %v571_v62, %v570_v27  ;;  %1187 = vxpose.xlu1.b32.cont [10/16] (narrow) %v1186_v32, 16  ;;  %v514_v40 = vsel %vm16_vm0, %v1696_v9, 0.0  ;;  %v579_v53 = vsel %vm16_vm0, %v1583_v3, 0.0 }
  0x2e   :  { %1028 = vmatprep.subr.bf16.mxu0 %v1027_v50  ;;  %v1190_v21 = vpack.i.bf16 %v1593_v11, %v1786_v61  ;;  %v516_v0 = vsel %vm16_vm0, %v1732_v16, 0.0  ;;  %v1033_v9 = vpack.c.bf16 %v1492_v7, %v1476_v60  ;;  %v1152_v3 = vpack.i.bf16 %v1539_v36, %v55_v44  ;;  %v87_v16 = vld [vmem:[%s2053_s1 + $0xe8] sm:$0xff]  ;;  %v56_v60 = vld [vmem:[%s2052_s0 + $0xf0] sm:$0xff]  ;;  %s1277_s0 = smov 16  }
  0x2f   :  { %v509_v46 = vadd.f32 %v508_v18, %v507_v35  ;;  %v574_v45 = vadd.f32 %v573_v38, %v572_v10  ;;  %1058 = vmatpush3.bf16.msra.mxu1 %v1761_v43  ;;  %v581_v54 = vsel %vm16_vm0, %v1624_v47, 0.0  ;;  %v1831_v62 = vpack.c.bf16 %v1593_v11, %v1570_v55  ;;  %v88_v35 = vld [vmem:[%s2053_s1 + $0xf0] sm:$0xff]  ;;  %v89_v10 = vld [vmem:[%s2053_s1 + $0xf8] sm:$0xff]  ;;  %s1278_s1 = smov [#allocation7]  }
  0x30   :  { %1060 = vmatprep.subr.bf16.mxu1 %v1773_v52  ;;  %1030 = vmatpush3.bf16.msra.mxu0 %v1029_v22  ;;  %v1035_v32 = vpack.c.bf16 %v55_v44, %v1768_v29  ;;  %v1838_v47 = vpack.c.bf16 %v87_v16, %v86_v20  ;;  %v518_v33 = vsel %vm16_vm0, %v1768_v29, 0.0  ;;  %v583_v55 = vsel %vm16_vm0, %v1672_v25, 0.0  ;;  %s886_s25 = sshll.u32 %s1278_s1, 4  ;;  %s887_s25 = int_to_ptr.vmem [resolvable:$true] %s886_s25 }
  0x31   :  { %1149 = vxpose.xlu0.b32.cont [12/16] (narrow) %v1148_v41, 16  ;;  %v511_v51 = vadd.f32 %v510_v12, %v509_v46  ;;  %v576_v42 = vadd.f32 %v575_v28, %v574_v45  ;;  %1189 = vxpose.xlu1.b32.cont [11/16] (narrow) %v1188_v57, 16  ;;  %v1192_v11 = vpack.i.bf16 %v1609_v31, %v86_v20  ;;  %v520_v27 = vsel %vm16_vm0, %v55_v44, 0.0  ;;  %s1252_s26 = scalar_lea.vmem %s887_s25, 16  ;;  %s1256_s27 = scalar_lea.vmem %s887_s25, 32 }
  0x32   :  { %1032 = vmatprep.subr.bf16.mxu0 %v1031_v17  ;;  %v1037_v50 = vpack.c.bf16 %v1539_v36, %v1518_v23  ;;  %v1154_v29 = vpack.i.bf16 %v1560_v49, %v56_v60  ;;  %v585_v25 = vsel %vm16_vm0, %v1714_v15, 0.0  ;;  %v1863_v12 = vpack.c.bf16 %v1629_v56, %v1609_v31  ;;  %p1253_p0 = scmp.ne.s32.totalorder %s887_s25, %s1252_s26  ;;  %p1257_p1 = scmp.lt.s32.totalorder %s887_s25, %s887_s25 }
  0x33   :  { %v513_v2 = vadd.f32 %v512_v37, %v511_v51  ;;  %v578_v26 = vadd.f32 %v577_v63, %v576_v42  ;;  %1062 = vmatpush3.bf16.msra.mxu1 %v1797_v6  ;;  %v1039_v23 = vpack.c.bf16 %v57_v19, %v56_v60  ;;  %v1866_v15 = vpack.c.bf16 %v89_v10, %v88_v35  ;;  %p1258_p2 = scmp.lt.s32.totalorder %s1256_s27, %s1252_s26 }
  0x34   :  { %1064 = vmatprep.subr.bf16.mxu1 %v1807_v34  ;;  %1034 = vmatpush3.bf16.msra.mxu0 %v1033_v9  ;;  %v522_v57 = vsel %vm16_vm0, %v56_v60, 0.0  ;;  %v587_v37 = vsel %vm16_vm0, %v1750_v14, 0.0  ;;  %v1194_v46 = vpack.i.bf16 %v1629_v56, %v87_v16  ;;  %v1041_v31 = vpack.c.bf16 %v1588_v4, %v1560_v49  ;;  %v462_v60 = vld [vmem:[#allocation5] sm:$0x1] }
  0x35   :  { %1151 = vxpose.xlu0.b32.cont [13/16] (narrow) %v1150_v8, 16  ;;  %v515_v7 = vadd.f32 %v514_v40, %v513_v2  ;;  %v580_v18 = vadd.f32 %v579_v53, %v578_v26  ;;  %1191 = vxpose.xlu1.b32.cont [12/16] (narrow) %v1190_v21, 16  ;;  %v1156_v8 = vpack.i.bf16 %v1588_v4, %v57_v19  ;;  %v524_v63 = vsel %vm16_vm0, %v57_v19, 0.0  ;;  %p1259_p3 = por %p1258_p2, %p1257_p1 }
  0x36   :  { %1036 = vmatprep.subr.bf16.mxu0 %v1035_v32  ;;  %v589_v17 = vsel %vm16_vm0, %v1786_v61, 0.0  ;;  %v1881_v14 = vpack.c.bf16 %v1677_v39, %v1647_v13  ;;  %v591_v49 = vsel %vm16_vm0, %v86_v20, 0.0  ;;  %v1196_v4 = vpack.i.bf16 %v1647_v13, %v88_v35 }
  0x37   :  { %v517_v38 = vadd.f32 %v516_v0, %v515_v7  ;;  %v582_v41 = vadd.f32 %v581_v54, %v580_v18  ;;  %1066 = vmatpush3.bf16.msra.mxu1 %v1831_v62  ;;  %v593_v61 = vsel %vm16_vm0, %v87_v16, 0.0  ;;  %v595_v21 = vsel %vm16_vm0, %v88_v35, 0.0  ;;  %p1260_p4 = pnand %p1259_p3, %p1253_p0 }
  0x38   :  { %1068 = vmatprep.subr.bf16.mxu1 %v1838_v47  ;;  %1038 = vmatpush3.bf16.msra.mxu0 %v1037_v50  ;;  %v1198_v0 = vpack.i.bf16 %v1677_v39, %v89_v10  ;;  %v597_v20 = vsel %vm16_vm0, %v89_v10, 0.0 }
  0x39   :  { %1153 = vxpose.xlu0.b32.cont [14/16] (narrow) %v1152_v3, 16  ;;  %v519_v36 = vadd.f32 %v518_v33, %v517_v38  ;;  %v584_v28 = vadd.f32 %v583_v55, %v582_v41  ;;  %1193 = vxpose.xlu1.b32.cont [13/16] (narrow) %v1192_v11, 16  ;;  %v535_v11 = vld [vmem:[#allocation6] sm:$0x1] }
  0x3a   :  { %1040 = vmatprep.subr.bf16.mxu0 %v1039_v23 }
  0x3b   :  { %v521_v45 = vadd.f32 %v520_v27, %v519_v36  ;;  %v586_v22 = vadd.f32 %v585_v25, %v584_v28  ;;  %1070 = vmatpush3.bf16.msra.mxu1 %v1863_v12 }
  0x3c   :  { %1072 = vmatprep.subr.bf16.mxu1 %v1866_v15  ;;  %1042 = vmatpush3.bf16.msra.mxu0 %v1041_v31 }
  0x3d   :  { %1155 = vxpose.xlu0.b32.cont [15/16] (narrow) %v1154_v29, 16  ;;  %v523_v56 = vadd.f32 %v522_v57, %v521_v45  ;;  %v588_v44 = vadd.f32 %v587_v37, %v586_v22  ;;  %1195 = vxpose.xlu1.b32.cont [14/16] (narrow) %v1194_v46, 16  ;;  %v237_v57 = vld [vmem:[#allocation3 + $0x8] sm:$0xff]  ;;  %v91_v46 = vld [vmem:[#allocation2 + $0x8] sm:$0xff] }
  0x3e   :  { %1076 = vmatprep.subr.bf16.mxu0 %v1651_v24 }
  0x3f   :  { %v525_v51 = vadd.f32 %v524_v63, %v523_v56  ;;  %v590_v42 = vadd.f32 %v589_v17, %v588_v44  ;;  %1074 = vmatpush3.bf16.msra.mxu1 %v1881_v14 }
  0x40   :  { %1107 = vmatprep.subr.bf16.mxu1 %v1651_v24 }
  0x41   :  { %1157 = vxpose.xlu0.b32.end [16/16] (narrow) %v1156_v8, 16  ;;  %v526_v40 = vrot.slane %v525_v51, 4  ;;  %v592_v53 = vadd.f32 %v591_v49, %v590_v42  ;;  %1197 = vxpose.xlu1.b32.cont [15/16] (narrow) %v1196_v4, 16  ;;  %v317_v49 = vld [vmem:[#allocation4] sm:$0xff] }
  0x43   :  { %v527_v13 = vadd.f32 %v526_v40, %v525_v51  ;;  %v594_v2 = vadd.f32 %v593_v61, %v592_v53  ;;  %v318_v51 = vld [vmem:[#allocation4 + $0x8] sm:$0xff] }
  0x45   :  { %v528_v26 = vrot.slane %v527_v13, 2  ;;  %v596_v9 = vadd.f32 %v595_v21, %v594_v2  ;;  %1199 = vxpose.xlu1.b32.end [16/16] (narrow) %v1198_v0, 16  ;;  %v697_v2 = vlaneseq }
  0x47   :  { %v529_v3 = vadd.f32 %v528_v26, %v527_v13  ;;  %v598_v54 = vadd.f32 %v597_v20, %v596_v9  ;;  %v1931_v20 = vshrl.u32 %v697_v2, 7  ;;  %v1933_v26 = vand.u32 127, %v697_v2 }
  0x49   :  { %v530_v16 = vrot.slane %v529_v3, 1  ;;  %v599_v32 = vrot.slane %v598_v54, 4  ;;  %vm704_vm2 = vcmp.eq.s32.totalorder %v1931_v20, %v1933_v26  ;;  %v1938_v9 = vadd.s32 8, %v1931_v20 }
  0x4a   :  { %vm772_vm9 = vcmp.eq.s32.totalorder %v1933_v26, %v1931_v20 }
  0x4b   :  { %v531_v7 = vadd.f32 %v530_v16, %v529_v3  ;;  %v600_v18 = vadd.f32 %v599_v32, %v598_v54  ;;  %vm705_vm4 = vcmp.eq.s32.totalorder %v1938_v9, %v1933_v26 }
  0x4d   :  { %v532_v24 = vadd.f32 %v531_v7, %v462_v60  ;;  %v601_v33 = vrot.slane %v600_v18, 2 }
  0x4f   :  { %534 = vst.msk [vmem:[#allocation5] sm:$0x1] %vm23_vm1, %v532_v24  ;;  %v602_v55 = vadd.f32 %v601_v33, %v600_v18 }
  0x51   :  { %v603_v39 = vrot.slane %v602_v55, 1 }
  0x53   :  { %v604_v27 = vadd.f32 %v603_v39, %v602_v55 }
  0x55   :  { %v605_v19 = vadd.f32 %v604_v27, %v535_v11  ;;  %v1953_v27 = vadd.s32 16, %v1931_v20 }
  0x57   :  { %606 = vst.msk [vmem:[#allocation6] sm:$0x1] %vm23_vm1, %v605_v19  ;;  %vm706_vm5 = vcmp.eq.s32.totalorder %v1953_v27, %v1933_v26  ;;  %vm770_vm7 = vcmp.eq.s32.totalorder %v1933_v26, %v1953_v27 }
  0x85   :  { %v1158_v38 = vpop.trf.xlu0 }
  0x86   :  { %v1159_v41 = vunpack.i.l.bf16 %v1158_v38  ;;  %v1162_v50 = vunpack.i.h.bf16 %v1158_v38  ;;  %v1958_v38 = vadd.s32 24, %v1931_v20 }
  0x88   :  { %220 = vmatprep.mubr.f32.mxu0 %v1159_v41  ;;  %302 = vmatprep.mubr.f32.mxu1 %v1159_v41  ;;  %vm707_vm6 = vcmp.eq.s32.totalorder %v1958_v38, %v1933_v26 }
  0x89   :  { %v1163_v29 = vpop.trf.xlu0  ;;  %221 = vmatmul.mubr.f32.vlgmr.msra.gmra.mrb[0].mxu0 %v1162_v50  ;;  %303 = vmatmul.mubr.f32.vlgmr.msra.gmra.mrb[0].mxu1 %v1162_v50  ;;  %v1200_v10 = vpop.trf.xlu1 }
  0x8a   :  { %1078 = vmatpush3.bf16.msra.mxu0 %v1655_v1  ;;  %1115 = vmatpush3.bf16.msra.mxu1 %v1655_v1  ;;  %v1164_v25 = vunpack.i.l.bf16 %v1163_v29  ;;  %v1167_v35 = vunpack.i.h.bf16 %v1163_v29  ;;  %v1201_v23 = vunpack.i.l.bf16 %v1200_v10 }
  0x8b   :  { %1080 = vmatprep.subr.bf16.mxu0 %v1665_v30  ;;  %1108 = vmatprep.subr.bf16.mxu1 %v1665_v30  ;;  %v1204_v30 = vunpack.i.h.bf16 %v1200_v10 }
  0x8c   :  { %307 = vmatprep.mubr.f32.mxu1 %v1164_v25  ;;  %225 = vmatprep.mubr.f32.mxu0 %v1164_v25 }
  0x8d   :  { %308 = vmatmul.mubr.f32.gmra.mrb[2].mxu1 %v1167_v35  ;;  %226 = vmatmul.mubr.f32.gmra.mrb[2].mxu0 %v1167_v35  ;;  %v1205_v1 = vpop.trf.xlu1 }
  0x8e   :  { %1082 = vmatpush3.bf16.msra.mxu0 %v1689_v48  ;;  %1116 = vmatpush3.bf16.msra.mxu1 %v1689_v48  ;;  %v1206_v36 = vunpack.i.l.bf16 %v1205_v1  ;;  %v1209_v48 = vunpack.i.h.bf16 %v1205_v1 }
  0x8f   :  { %1084 = vmatprep.subr.bf16.mxu0 %v1701_v59  ;;  %1109 = vmatprep.subr.bf16.mxu1 %v1701_v59 }
  0x90   :  { %447 = vmatprep.mubr.f32.mxu0 %v1201_v23  ;;  %452 = vmatprep.mubr.f32.mxu1 %v1206_v36 }
  0x92   :  { %1086 = vmatpush3.bf16.msra.mxu0 %v1725_v58  ;;  %1117 = vmatpush3.bf16.msra.mxu1 %v1725_v58 }
  0x93   :  { %1088 = vmatprep.subr.bf16.mxu0 %v1737_v5  ;;  %1110 = vmatprep.subr.bf16.mxu1 %v1737_v5  ;;  %v90_v5 = vld [vmem:[#allocation2] sm:$0xff] }
  0x96   :  { %1090 = vmatpush3.bf16.msra.mxu0 %v1761_v43  ;;  %1118 = vmatpush3.bf16.msra.mxu1 %v1761_v43 }
  0x97   :  { %1092 = vmatprep.subr.bf16.mxu0 %v1773_v52  ;;  %1111 = vmatprep.subr.bf16.mxu1 %v1773_v52  ;;  %v236_v52 = vld [vmem:[#allocation3] sm:$0xff] }
  0x9a   :  { %1094 = vmatpush3.bf16.msra.mxu0 %v1797_v6  ;;  %1119 = vmatpush3.bf16.msra.mxu1 %v1797_v6 }
  0x9b   :  { %1096 = vmatprep.subr.bf16.mxu0 %v1807_v34  ;;  %1112 = vmatprep.subr.bf16.mxu1 %v1807_v34 }
  0x9e   :  { %1098 = vmatpush3.bf16.msra.mxu0 %v1831_v62  ;;  %1120 = vmatpush3.bf16.msra.mxu1 %v1831_v62 }
  0x9f   :  { %1100 = vmatprep.subr.bf16.mxu0 %v1838_v47  ;;  %1113 = vmatprep.subr.bf16.mxu1 %v1838_v47 }
  0xa2   :  { %1102 = vmatpush3.bf16.msra.mxu0 %v1863_v12  ;;  %1121 = vmatpush3.bf16.msra.mxu1 %v1863_v12 }
  0xa3   :  { %1104 = vmatprep.subr.bf16.mxu0 %v1866_v15  ;;  %1114 = vmatprep.subr.bf16.mxu1 %v1866_v15 }
  0xa6   :  { %1106 = vmatpush3.bf16.msra.mxu0 %v1881_v14  ;;  %1122 = vmatpush3.bf16.msra.mxu1 %v1881_v14 }
  0xa9   :  { %448 = vmatmul.mubr.f32.vlgmr.msra.gmra.mrb[4].mxu0 %v1204_v30  ;;  %453 = vmatmul.mubr.f32.vlgmr.msra.gmra.mrb[4].mxu1 %v1209_v48 }
 0x15c   :  { %v929_v59 = vpop.f32.mrb[0].mxu0  ;;  %v967_v58 = vpop.f32.mrb[0].mxu1 }
 0x15d   :  { %v930_v43 = vpop.f32.mrb[1].mxu0  ;;  %v968_v6 = vpop.f32.mrb[1].mxu1 }
 0x15e   :  { %v931_v34 = vadd.f32 %v930_v43, %v929_v59  ;;  %v969_v62 = vadd.f32 %v968_v6, %v967_v58 }
 0x160   :  { %v231_v47 = vadd.f32 %v931_v34, %v90_v5  ;;  %v313_v12 = vadd.f32 %v969_v62, %v236_v52  ;;  %v970_v28 = vpop.f32.mrb[2].mxu1  ;;  %v932_v15 = vpop.f32.mrb[2].mxu0 }
 0x161   :  { %v971_v37 = vpop.f32.mrb[3].mxu1  ;;  %v933_v45 = vpop.f32.mrb[3].mxu0 }
 0x162   :  { %234 = vst.msk [vmem:[#allocation2] sm:$0xff] %vm16_vm0, %v231_v47  ;;  %315 = vst.msk [vmem:[#allocation3] sm:$0xff] %vm16_vm0, %v313_v12  ;;  %v972_v22 = vadd.f32 %v971_v37, %v970_v28  ;;  %v934_v31 = vadd.f32 %v933_v45, %v932_v15 }
 0x164   :  { %v314_v8 = vadd.f32 %v972_v22, %v237_v57  ;;  %v232_v63 = vadd.f32 %v934_v31, %v91_v46 }
 0x166   :  { %316 = vst.msk [vmem:[#allocation3 + $0x8] sm:$0xff] %vm16_vm0, %v314_v8  ;;  %235 = vst.msk [vmem:[#allocation2 + $0x8] sm:$0xff] %vm16_vm0, %v232_v63 }
 0x169   :  { %v641_v17 = vld [vmem:[#allocation3] sm:$0xff]  ;;  %v639_v54 = vld [vmem:[#allocation2] sm:$0xff] }
 0x16a   :  { %647 = vrot.lane.b32.xlu0 %v641_v17, %s1277_s0 }
 0x16d   :  { %v642_v14 = vld [vmem:[#allocation3 + $0x8] sm:$0xff]  ;;  %v640_v18 = vld [vmem:[#allocation2 + $0x8] sm:$0xff] }
 0x16e   :  { %649 = vrot.lane.b32.xlu1 %v642_v14, %s1277_s0 }
 0x17c   :  { %v1005_v56 = vpop.f32.mrb[4].mxu0  ;;  %v1008_v44 = vpop.f32.mrb[4].mxu1 }
 0x17d   :  { %v1006_v4 = vpop.f32.mrb[5].mxu0  ;;  %v1009_v42 = vpop.f32.mrb[5].mxu1 }
 0x17e   :  { %v1007_v61 = vadd.f32 %v1006_v4, %v1005_v56  ;;  %v1010_v40 = vadd.f32 %v1009_v42, %v1008_v44 }
 0x180   :  { %v458_v53 = vadd.f32 %v1007_v61, %v317_v49  ;;  %v459_v21 = vadd.f32 %v1010_v40, %v318_v51 }
 0x182   :  { %460 = vst.msk [vmem:[#allocation4] sm:$0xff] %vm16_vm0, %v458_v53  ;;  %461 = vst.msk [vmem:[#allocation4 + $0x8] sm:$0xff] %vm16_vm0, %v459_v21 }
 0x189   :  { %v643_v0 = vld [vmem:[#allocation4] sm:$0xff]  ;;  %v644_v13 = vld [vmem:[#allocation4 + $0x8] sm:$0xff] }
 0x18a   :  { %689 = vrot.lane.b32.xlu1 %v643_v0, %s1277_s0 }
 0x18e   :  { %691 = vrot.lane.b32.xlu1 %v644_v13, %s1277_s0 }
 0x1b7   :  { %655 = vxpose.xlu1.b32.start [1/2] (short) (narrow) %v641_v17, 16 }
 0x1bb   :  { %656 = vxpose.xlu1.b32.end [2/2] (short) (narrow) %v642_v14, 16 }
 0x1dc   :  { %v648_v3 = vpop.permute.xlu0 %647 }
 0x1dd   :  { %v653_v16 = vsel %vm16_vm0, %v639_v54, %v648_v3 }
 0x1de   :  { %v708_v32 = vsel %vm704_vm2, %v653_v16, 0.0 }
 0x1df   :  { %v713_v60 = vsel %vm712_vm3, %v708_v32, 0.0  ;;  %v610_v32 = vld [vmem:[#allocation5] sm:$0x1] }
 0x1e0   :  { %v650_v7 = vpop.permute.xlu1 %649  ;;  %714 = vadd.xlane.f32.xlu0 %v713_v60 }
 0x1e1   :  { %v654_v24 = vsel %vm16_vm0, %v640_v18, %v650_v7  ;;  %v612_v7 = vsel %vm23_vm1, %v610_v32, 0.0  ;;  %v611_v18 = vld [vmem:[#allocation6] sm:$0x1] }
 0x1e2   :  { %v709_v33 = vsel %vm705_vm4, %v654_v24, 0.0 }
 0x1e3   :  { %v716_v55 = vsel %vm712_vm3, %v709_v33, 0.0  ;;  %v760_v33 = vadd.s32 16, %v1938_v9 }
 0x1e4   :  { %717 = vadd.xlane.f32.xlu0 %v716_v55  ;;  %v725_v39 = vadd.f32 %v716_v55, %v713_v60 }
 0x1e5   :  { %vm771_vm8 = vcmp.eq.s32.totalorder %v1933_v26, %v760_v33 }
 0x1fc   :  { %v690_v11 = vpop.permute.xlu1 %689 }
 0x200   :  { %v692_v19 = vpop.permute.xlu1 %691 }
 0x237   :  { %v671_v41 = vpop.trf.xlu1 }
 0x238   :  { %v695_v50 = vsel %vm16_vm0, %v671_v41, %v690_v11 }
 0x239   :  { %v710_v29 = vsel %vm706_vm5, %v695_v50, 0.0 }
 0x23a   :  { %v719_v25 = vsel %vm712_vm3, %v710_v29, 0.0 }
 0x23b   :  { %v672_v35 = vpop.trf.xlu1  ;;  %720 = vadd.xlane.f32.xlu0 %v719_v25  ;;  %v726_v23 = vadd.f32 %v725_v39, %v719_v25 }
 0x23c   :  { %v696_v10 = vsel %vm16_vm0, %v672_v35, %v692_v19  ;;  %v896_v19 = vadd.s32 4294967280, %v1958_v38 }
 0x23d   :  { %v711_v1 = vsel %vm707_vm6, %v696_v10, 0.0 }
 0x23e   :  { %v722_v36 = vsel %vm712_vm3, %v711_v1, 0.0  ;;  %vm773_vm10 = vcmp.eq.s32.totalorder %v1933_v26, %v896_v19 }
 0x23f   :  { %723 = vadd.xlane.f32.xlu0 %v722_v36  ;;  %v727_v30 = vadd.f32 %v726_v23, %v722_v36 }
 0x241   :  { %v728_v48 = vrot.slane %v727_v30, 4 }
 0x243   :  { %v729_v59 = vadd.f32 %v728_v48, %v727_v30 }
 0x245   :  { %v730_v58 = vrot.slane %v729_v59, 2 }
 0x247   :  { %v731_v5 = vadd.f32 %v730_v58, %v729_v59 }
 0x249   :  { %v732_v43 = vrot.slane %v731_v5, 1 }
 0x24b   :  { %v733_v52 = vadd.f32 %v732_v43, %v731_v5 }
 0x24d   :  { %v746_v6 = vmax.f32 %v733_v52, 1e-16 }
 0x24f   :  { %1210 = vrsqrt.f32 %v746_v6 }
 0x259   :  { %v1211_v34 = vpop.eup %1210 }
 0x25a   :  { %v750_v62 = vmul.f32 %v1211_v34, %v695_v50  ;;  %v751_v47 = vmul.f32 %v1211_v34, %v696_v10  ;;  %v748_v45 = vmul.f32 %v1211_v34, %v653_v16  ;;  %v749_v63 = vmul.f32 %v1211_v34, %v654_v24 }
 0x25b   :  { %v617_v24 = vsel %vm23_vm1, %v611_v18, 0.0 }
 0x26d   :  { %v715_v12 = vpop.xlane.xlu0 %714 }
 0x26e   :  { %v734_v28 = vmax.f32 %v715_v12, 1e-16 }
 0x270   :  { %1212 = vrsqrt.f32 %v734_v28 }
 0x271   :  { %v718_v15 = vpop.xlane.xlu0 %717 }
 0x272   :  { %v735_v57 = vmax.f32 %v718_v15, 1e-16 }
 0x274   :  { %1214 = vrsqrt.f32 %v735_v57 }
 0x27a   :  { %v1213_v37 = vpop.eup %1212 }
 0x27b   :  { %v742_v46 = vmul.f32 2.0, %v1213_v37 }
 0x27d   :  { %v752_v22 = vmul.f32 %v748_v45, %v742_v46 }
 0x27e   :  { %v1215_v31 = vpop.eup %1214 }
 0x27f   :  { %v743_v8 = vmul.f32 2.0, %v1215_v31  ;;  %v790_v17 = vsel %vm704_vm2, -inf, %v752_v22  ;;  %v774_v55 = vsel %vm770_vm7, %v752_v22, 0.0 }
 0x280   :  { %v794_v14 = vsel %vm712_vm3, %v790_v17, -inf  ;;  %v778_v39 = vsel %vm712_vm3, %v774_v55, 0.0 }
 0x281   :  { %v753_v56 = vmul.f32 %v749_v63, %v743_v8  ;;  %795 = vmax.xlane.f32.xlu1 %v794_v14 }
 0x283   :  { %v791_v44 = vsel %vm705_vm4, -inf, %v753_v56  ;;  %v775_v11 = vsel %vm771_vm8, %v753_v56, 0.0 }
 0x284   :  { %v797_v49 = vsel %vm712_vm3, %v791_v44, -inf  ;;  %v781_v41 = vsel %vm712_vm3, %v775_v11, 0.0 }
 0x285   :  { %798 = vmax.xlane.f32.xlu0 %v797_v49 }
 0x2c8   :  { %v721_v4 = vpop.xlane.xlu0 %720 }
 0x2c9   :  { %v736_v51 = vmax.f32 %v721_v4, 1e-16 }
 0x2cb   :  { %1216 = vrsqrt.f32 %v736_v51 }
 0x2cc   :  { %v724_v42 = vpop.xlane.xlu0 %723 }
 0x2cd   :  { %v737_v61 = vmax.f32 %v724_v42, 1e-16 }
 0x2cf   :  { %1218 = vrsqrt.f32 %v737_v61 }
 0x2d5   :  { %v1217_v40 = vpop.eup %1216 }
 0x2d6   :  { %v744_v53 = vmul.f32 2.0, %v1217_v40 }
 0x2d8   :  { %v754_v21 = vmul.f32 %v750_v62, %v744_v53 }
 0x2d9   :  { %v1219_v0 = vpop.eup %1218 }
 0x2da   :  { %v745_v13 = vmul.f32 2.0, %v1219_v0  ;;  %v792_v2 = vsel %vm706_vm5, -inf, %v754_v21  ;;  %v776_v50 = vsel %vm772_vm9, %v754_v21, 0.0 }
 0x2db   :  { %v800_v3 = vsel %vm712_vm3, %v792_v2, -inf  ;;  %v784_v29 = vsel %vm712_vm3, %v776_v50, 0.0 }
 0x2dc   :  { %801 = vmax.xlane.f32.xlu0 %v800_v3  ;;  %v755_v54 = vmul.f32 %v751_v47, %v745_v13 }
 0x2de   :  { %v793_v16 = vsel %vm707_vm6, -inf, %v755_v54  ;;  %v777_v25 = vsel %vm773_vm10, %v755_v54, 0.0 }
 0x2df   :  { %v803_v60 = vsel %vm712_vm3, %v793_v16, -inf  ;;  %v787_v35 = vsel %vm712_vm3, %v777_v25, 0.0 }
 0x2e0   :  { %804 = vmax.xlane.f32.xlu0 %v803_v60 }
 0x2e4   :  { %613 = vadd.xlane.f32.xlu0 %v612_v7 }
 0x2e8   :  { %618 = vadd.xlane.f32.xlu0 %v617_v24 }
 0x2ec   :  { %779 = vadd.xlane.f32.xlu0 %v778_v39 }
 0x2f0   :  { %782 = vadd.xlane.f32.xlu0 %v781_v41 }
 0x2f4   :  { %785 = vadd.xlane.f32.xlu0 %v784_v29 }
 0x2f8   :  { %788 = vadd.xlane.f32.xlu0 %v787_v35 }
 0x30e   :  { %v2002_v10 = vpop.xlane.xlu1 %795 }
 0x30f   :  { %v818_v23 = vsub.f32 %v752_v22, %v2002_v10 }
 0x311   :  { %v822_v1 = vmul.f32 1.442695, %v818_v23 }
 0x312   :  { %v2005_v36 = vpop.xlane.xlu0 %798 }
 0x313   :  { %1220 = vpow2.f32 %v822_v1  ;;  %v819_v30 = vsub.f32 %v753_v56, %v2005_v36 }
 0x315   :  { %v824_v48 = vmul.f32 1.442695, %v819_v30 }
 0x317   :  { %1222 = vpow2.f32 %v824_v48 }
 0x31d   :  { %v1221_v59 = vpop.eup %1220 }
 0x31e   :  { %v830_v58 = vsel %vm704_vm2, 0.0, %v1221_v59 }
 0x31f   :  { %v834_v5 = vsel %vm712_vm3, %v830_v58, 0.0 }
 0x320   :  { %835 = vadd.xlane.f32.xlu0 %v834_v5 }
 0x321   :  { %v1223_v43 = vpop.eup %1222 }
 0x322   :  { %v831_v52 = vsel %vm705_vm4, 0.0, %v1223_v43 }
 0x323   :  { %v837_v6 = vsel %vm712_vm3, %v831_v52, 0.0 }
 0x324   :  { %838 = vadd.xlane.f32.xlu1 %v837_v6 }
 0x369   :  { %v2016_v34 = vpop.xlane.xlu0 %801 }
 0x36a   :  { %v820_v62 = vsub.f32 %v754_v21, %v2016_v34 }
 0x36c   :  { %v826_v47 = vmul.f32 1.442695, %v820_v62 }
 0x36d   :  { %v2019_v12 = vpop.xlane.xlu0 %804 }
 0x36e   :  { %1224 = vpow2.f32 %v826_v47  ;;  %v821_v20 = vsub.f32 %v755_v54, %v2019_v12 }
 0x370   :  { %v828_v28 = vmul.f32 1.442695, %v821_v20 }
 0x371   :  { %v614_v15 = vpop.xlane.xlu0 %613 }
 0x372   :  { %1226 = vpow2.f32 %v828_v28 }
 0x373   :  { %1228 = vrcp.f32 %v614_v15 }
 0x375   :  { %v619_v57 = vpop.xlane.xlu0 %618 }
 0x376   :  { %1230 = vrcp.f32 %v619_v57 }
 0x378   :  { %v1225_v9 = vpop.eup %1224 }
 0x379   :  { %v832_v37 = vsel %vm706_vm5, 0.0, %v1225_v9  ;;  %v780_v38 = vpop.xlane.xlu0 %779 }
 0x37a   :  { %v840_v46 = vsel %vm712_vm3, %v832_v37, 0.0  ;;  %v806_v0 = vsub.f32 %v780_v38, %v2002_v10 }
 0x37b   :  { %841 = vadd.xlane.f32.xlu0 %v840_v46 }
 0x37c   :  { %v1227_v45 = vpop.eup %1226  ;;  %v810_v3 = vmul.f32 1.442695, %v806_v0 }
 0x37d   :  { %v1229_v22 = vpop.eup %1228  ;;  %v833_v31 = vsel %vm707_vm6, 0.0, %v1227_v45  ;;  %v783_v53 = vpop.xlane.xlu0 %782 }
 0x37e   :  { %v843_v8 = vsel %vm712_vm3, %v833_v31, 0.0  ;;  %v616_v63 = vmul.f32 %v1229_v22, %v610_v32  ;;  %v807_v21 = vsub.f32 %v783_v53, %v2005_v36 }
 0x37f   :  { %844 = vadd.xlane.f32.xlu1 %v843_v8 }
 0x380   :  { %v1231_v17 = vpop.eup %1230  ;;  %v622_v14 = vadd.f32 1e-08, %v616_v63  ;;  %v812_v13 = vmul.f32 1.442695, %v807_v21 }
 0x381   :  { %v621_v56 = vmul.f32 %v1231_v17, %v611_v18  ;;  %v786_v2 = vpop.xlane.xlu0 %785 }
 0x382   :  { %1232 = vlog2.f32 %v622_v14  ;;  %v808_v54 = vsub.f32 %v786_v2, %v2016_v34 }
 0x383   :  { %v630_v44 = vadd.f32 1e-08, %v621_v56 }
 0x384   :  { %v814_v32 = vmul.f32 1.442695, %v808_v54 }
 0x385   :  { %1234 = vlog2.f32 %v630_v44  ;;  %v789_v16 = vpop.xlane.xlu0 %788 }
 0x386   :  { %1236 = vpow2.f32 %v812_v13  ;;  %v809_v60 = vsub.f32 %v789_v16, %v2019_v12 }
 0x387   :  { %1238 = vpow2.f32 %v810_v3 }
 0x388   :  { %1240 = vpow2.f32 %v814_v32  ;;  %v816_v24 = vmul.f32 1.442695, %v809_v60 }
 0x38a   :  { %1242 = vpow2.f32 %v816_v24 }
 0x38c   :  { %v1233_v27 = vpop.eup %1232 }
 0x38d   :  { %v624_v49 = vmul.f32 0.6931472, %v1233_v27 }
 0x38f   :  { %v1235_v4 = vpop.eup %1234  ;;  %v625_v51 = vmul.f32 %v624_v49, %v616_v63 }
 0x390   :  { %v632_v42 = vmul.f32 0.6931472, %v1235_v4  ;;  %v1237_v18 = vpop.eup %1236 }
 0x391   :  { %v626_v61 = vsel %vm23_vm1, %v625_v51, 0.0  ;;  %v1239_v39 = vpop.eup %1238 }
 0x392   :  { %v633_v40 = vmul.f32 %v632_v42, %v621_v56  ;;  %627 = vadd.xlane.f32.xlu0 %v626_v61  ;;  %v1241_v19 = vpop.eup %1240 }
 0x394   :  { %v634_v26 = vsel %vm23_vm1, %v633_v40, 0.0  ;;  %v1243_v29 = vpop.eup %1242 }
 0x395   :  { %635 = vadd.xlane.f32.xlu1 %v634_v26 }
 0x3ad   :  { %v836_v33 = vpop.xlane.xlu0 %835 }
 0x3ae   :  { %v846_v11 = vadd.f32 %v1239_v39, %v836_v33 }
 0x3b1   :  { %v839_v7 = vpop.xlane.xlu1 %838 }
 0x3b2   :  { %v847_v55 = vadd.f32 %v1237_v18, %v839_v7 }
 0x3b4   :  { %1244 = vlog2.f32 %v847_v55 }
 0x3b5   :  { %1246 = vlog2.f32 %v846_v11 }
 0x3be   :  { %v1245_v35 = vpop.eup %1244 }
 0x3bf   :  { %v1247_v1 = vpop.eup %1246  ;;  %v853_v30 = vmul.f32 0.6931472, %v1245_v35 }
 0x3c0   :  { %v851_v48 = vmul.f32 0.6931472, %v1247_v1 }
 0x3c1   :  { %v859_v59 = vadd.f32 %v853_v30, %v2005_v36 }
 0x3c2   :  { %v858_v5 = vadd.f32 %v851_v48, %v2002_v10 }
 0x3c3   :  { %v863_v52 = vsub.f32 %v859_v59, %v783_v53 }
 0x3c4   :  { %v862_v47 = vsub.f32 %v858_v5, %v780_v38 }
 0x3c6   :  { %v866_v15 = vadd.f32 %v863_v52, %v862_v47 }
 0x408   :  { %v842_v41 = vpop.xlane.xlu0 %841 }
 0x409   :  { %v848_v50 = vadd.f32 %v1241_v19, %v842_v41 }
 0x40b   :  { %1248 = vlog2.f32 %v848_v50 }
 0x40c   :  { %v845_v25 = vpop.xlane.xlu1 %844 }
 0x40d   :  { %v849_v23 = vadd.f32 %v1243_v29, %v845_v25 }
 0x40f   :  { %1250 = vlog2.f32 %v849_v23 }
 0x415   :  { %v1249_v58 = vpop.eup %1248 }
 0x416   :  { %v855_v43 = vmul.f32 0.6931472, %v1249_v58 }
 0x418   :  { %v860_v6 = vadd.f32 %v855_v43, %v2016_v34 }
 0x419   :  { %v1251_v62 = vpop.eup %1250 }
 0x41a   :  { %v864_v20 = vsub.f32 %v860_v6, %v786_v2  ;;  %v857_v28 = vmul.f32 0.6931472, %v1251_v62 }
 0x41c   :  { %v861_v57 = vadd.f32 %v857_v28, %v2019_v12  ;;  %v867_v9 = vadd.f32 %v866_v15, %v864_v20 }
 0x41e   :  { %v865_v37 = vsub.f32 %v861_v57, %v789_v16 }
 0x41f   :  { %v628_v10 = vpop.xlane.xlu0 %627 }
 0x420   :  { %v868_v46 = vadd.f32 %v867_v9, %v865_v37  ;;  %v629_v14 = vadd.f32 2.7725887, %v628_v10 }
 0x422   :  { %v869_v45 = vrot.slane %v868_v46, 4  ;;  %v636_v31 = vpop.xlane.xlu1 %635 }
 0x423   :  { %v637_v63 = vadd.f32 2.7725887, %v636_v31 }
 0x424   :  { %v870_v22 = vadd.f32 %v869_v45, %v868_v46 }
 0x425   :  { %v638_v56 = vadd.f32 %v637_v63, %v629_v14 }
 0x426   :  { %v871_v36 = vrot.slane %v870_v22, 2 }
 0x428   :  { %v872_v8 = vadd.f32 %v871_v36, %v870_v22 }
 0x42a   :  { %v873_v17 = vrot.slane %v872_v8, 1 }
 0x42c   :  { %v874_v34 = vadd.f32 %v873_v17, %v872_v8 }
 0x42e   :  { %v876_v44 = vmul.f32 0.03125, %v874_v34 }
 0x430   :  { %v877_v27 = vadd.f32 %v876_v44, %v638_v56 }
 0x432   :  { %879 = vst.msk [vmem:[#allocation7] sm:$0x1] %vm878_vm11, %v877_v27 }
 0x433   :  { %1263 = shalt.err (!%p1260_p4)
}
 0x434   :  { %s1264_s30 = scalar_lea.hbm %s2054_s2, 16 }
 0x435   :  { %p1265_p5 = scmp.ne.s32.totalorder %s2054_s2, %s1264_s30  ;;  %p1268_p6 = scmp.lt.u32.totalorder %s1264_s30, %s2054_s2 }
 0x437   :  { %p1270_p7 = pnand %p1268_p6, %p1265_p5 }
 0x439   :  { %1273 = shalt.err (!%p1270_p7)
}
 0x43a   :  { %889 = dma.vmem_to_hbm [thread:$0]  %s887_s25, 16, %s2054_s2, [#allocation8]  }
 0x43b   :  { %1274 = dma.done.wait [#allocation8], 16  }
 0x43c   :  { %1275 = vsyncadd [#allocation8], 4294967280 }
 0x43d   :  { %893 = vsyncpa [#allocation8], 1 }

</bundles_post_ra>
